<compile_context>
chip_gen: v5e
topology: v5e:2x2
jax: 0.10.0
libtpu: 0.0.40
codegen_flags: <defaults>
</compile_context>

<pallas_src>
import jax
import jax.numpy as jnp
from jax.experimental import pallas as pl
from jax.experimental.pallas import tpu as pltpu


def _choose_h_tile(H, target=512):
    """Largest lane-dense (multiple of 128) tile <= target that divides H, else full H."""
    if H % 128 != 0:
        return H
    best = 128
    t = 128
    while t <= min(H, target):
        if H % t == 0:
            best = t
        t += 128
    return best


def mean_pool_kernel(len_ref, h_ref, m_ref, o_ref):
    # len_ref: (B,) f32 in SMEM (scalar prefetch)
    # h_ref block: (1, S, tH) native dtype
    # m_ref block: (1, 1, S)  same dtype as hidden
    # o_ref block: (1, 1, tH) float32
    b = pl.program_id(0)
    h = h_ref[0]                                              # (S, tH), native dtype
    m = m_ref[0]                                              # (1, S)
    s = jnp.dot(m, h, preferred_element_type=jnp.float32)     # (1, tH) f32 accumulate
    inv = 1.0 / len_ref[b]                                    # scalar path; pre-clamped
    o_ref[0] = s * inv


def mean_pooling(hidden_states, input_ids, attention_mask, *, h_tile=None):
    """Pallas equivalent of MeanPooling.forward.

    hidden_states: [B, S, H] float (f32 or bf16)
    input_ids:     [B, S] int (unused, kept for signature parity)
    attention_mask:[B, S] int/float
    returns:       [B, H] float32
    """
    del input_ids  # not used by the reference forward pass
    B, S, H = hidden_states.shape
    dt = hidden_states.dtype

    # Mask in the hidden dtype (0/1 values are exact in bf16), shaped (B, 1, S).
    mask_f = attention_mask.astype(dt).reshape(B, 1, S)

    # Per-batch token counts, clamped so an all-zero mask row doesn't give inf/nan.
    lengths = jnp.maximum(
        jnp.sum(attention_mask.astype(jnp.float32), axis=1), 1e-9
    )  # (B,)

    tH = h_tile if h_tile is not None else _choose_h_tile(H)
    assert H % tH == 0, "h_tile must divide H"

    out = pl.pallas_call(
        mean_pool_kernel,
        out_shape=jax.ShapeDtypeStruct((B, 1, H), jnp.float32),
        grid_spec=pltpu.PrefetchScalarGridSpec(
            num_scalar_prefetch=1,
            grid=(B, H // tH),
            in_specs=[
                pl.BlockSpec((1, S, tH), lambda b, j, lens: (b, 0, j)),
                pl.BlockSpec((1, 1, S), lambda b, j, lens: (b, 0, 0)),
            ],
            out_specs=pl.BlockSpec((1, 1, tH), lambda b, j, lens: (b, 0, j)),
        ),
        compiler_params=pltpu.CompilerParams(
            dimension_semantics=("parallel", "parallel"),
        ),
    )(lengths, hidden_states, mask_f)

    return out.reshape(B, H)


def _ref_mean_pooling(hidden_states, attention_mask):
    m = attention_mask.astype(jnp.float32)[:, :, None]
    s = jnp.sum(hidden_states.astype(jnp.float32) * m, axis=1)
    d = jnp.maximum(
        jnp.sum(attention_mask.astype(jnp.float32), axis=1, keepdims=True), 1e-9
    )
    return s / d


if __name__ == "__main__":
    key = jax.random.PRNGKey(0)
    k_h, k_ids, k_h2 = jax.random.split(key, 3)

    # ---- check 1: small f32 shapes (full-H block, no tiling) ----
    B, S, H = 2, 8, 32
    hidden_states = jax.random.normal(k_h, (B, S, H), dtype=jnp.float32)
    input_ids = jax.random.randint(k_ids, (B, S), 0, 1000, dtype=jnp.int32)
    lengths = jnp.array([5, 8], dtype=jnp.int32)
    attention_mask = (jnp.arange(S)[None, :] < lengths[:, None]).astype(jnp.int32)

    out = mean_pooling(hidden_states, input_ids, attention_mask)
    out = jax.block_until_ready(out)
    ref = _ref_mean_pooling(hidden_states, attention_mask)
    assert out.shape == (B, H)
    assert jnp.allclose(out, ref, atol=1e-5, rtol=1e-5)

    # ---- check 2: bf16 hidden with H tiling (tH = 128) exercised ----
    B2, S2, H2 = 2, 16, 256
    hidden2 = jax.random.normal(k_h2, (B2, S2, H2), dtype=jnp.bfloat16)
    ids2 = jnp.zeros((B2, S2), dtype=jnp.int32)
    lens2 = jnp.array([9, 16], dtype=jnp.int32)
    mask2 = (jnp.arange(S2)[None, :] < lens2[:, None]).astype(jnp.int32)

    out2 = mean_pooling(hidden2, ids2, mask2, h_tile=128)
    out2 = jax.block_until_ready(out2)
    ref2 = _ref_mean_pooling(hidden2, mask2)
    assert out2.shape == (B2, H2)
    assert jnp.allclose(out2, ref2, atol=1e-2, rtol=1e-2)

    print("KERNEL_OK")
</pallas_src>

<mosaic_0001>
module attributes {stable_mosaic.version = 11 : i64} {
  func.func @mean_pool_kernel(%arg0: i32, %arg1: i32, %arg2: memref<2xf32, #tpu.memory_space<smem>>, %arg3: memref<1x8x32xf32, #tpu.memory_space<vmem>>, %arg4: memref<1x1x8xf32, #tpu.memory_space<vmem>>, %arg5: memref<1x1x32xf32, #tpu.memory_space<vmem>>) attributes {dimension_semantics = [#tpu.dimension_semantics<parallel>, #tpu.dimension_semantics<parallel>], iteration_bounds = array<i64: 2, 1>, scalar_prefetch = 1 : i64, scratch_operands = 0 : i64, tpu.core_type = #tpu.core_type<tc>, window_params = [{transform_indices = @transform_0, window_bounds = array<i64: 1, 8, 32>}, {transform_indices = @transform_1, window_bounds = array<i64: 1, 1, 8>}, {transform_indices = @transform_2, window_bounds = array<i64: 1, 1, 32>}]} {
    %c0 = arith.constant 0 : index
    %c0_0 = arith.constant 0 : index
    %c0_1 = arith.constant 0 : index
    %0 = vector.load %arg3[%c0, %c0_0, %c0_1] : memref<1x8x32xf32, #tpu.memory_space<vmem>>, vector<1x8x32xf32>
    %1 = vector.shape_cast %0 : vector<1x8x32xf32> to vector<8x32xf32>
    %c0_2 = arith.constant 0 : index
    %c0_3 = arith.constant 0 : index
    %c0_4 = arith.constant 0 : index
    %2 = vector.load %arg4[%c0_2, %c0_3, %c0_4] : memref<1x1x8xf32, #tpu.memory_space<vmem>>, vector<1x1x8xf32>
    %3 = vector.shape_cast %2 : vector<1x1x8xf32> to vector<1x8xf32>
    %cst = arith.constant dense<0.000000e+00> : vector<1x32xf32>
    %4 = tpu.matmul %3, %1, %cst {dimension_numbers = #tpu.dot_dimension_numbers<[1], [0], [0], [1], [0, 0, 1, 1], [], []>} : vector<1x8xf32>, vector<8x32xf32>, vector<1x32xf32> -> vector<1x32xf32>
    %5 = arith.index_cast %arg0 : i32 to index
    %6 = memref.load %arg2[%5] : memref<2xf32, #tpu.memory_space<smem>>
    %cst_5 = arith.constant 1.000000e+00 : f32
    %7 = arith.divf %cst_5, %6 : f32
    %8 = vector.broadcast %7 : f32 to vector<1x32xf32>
    %9 = arith.mulf %4, %8 : vector<1x32xf32>
    %c0_6 = arith.constant 0 : index
    %c0_7 = arith.constant 0 : index
    %c0_8 = arith.constant 0 : index
    %10 = vector.load %arg5[%c0_6, %c0_7, %c0_8] : memref<1x1x32xf32, #tpu.memory_space<vmem>>, vector<1x1x32xf32>
    %11 = vector.shape_cast %10 : vector<1x1x32xf32> to vector<1x32xf32>
    %12 = vector.shape_cast %9 : vector<1x32xf32> to vector<1x1x32xf32>
    tpu.vector_store %arg5[%c0_6, %c0_7, %c0_8], %12 {strides = array<i32>} : memref<1x1x32xf32, #tpu.memory_space<vmem>>, vector<1x1x32xf32>,
    return
  }
  func.func @transform_0(%arg0: i32, %arg1: i32, %arg2: memref<2xf32, #tpu.memory_space<smem>>) -> (i32, i32, i32) {
    %c0_i32 = arith.constant 0 : i32
    %c0_i32_0 = arith.constant 0 : i32
    return %arg0, %c0_i32, %arg1 : i32, i32, i32
  }
  func.func @transform_1(%arg0: i32, %arg1: i32, %arg2: memref<2xf32, #tpu.memory_space<smem>>) -> (i32, i32, i32) {
    %c0_i32 = arith.constant 0 : i32
    %c0_i32_0 = arith.constant 0 : i32
    %c0_i32_1 = arith.constant 0 : i32
    return %arg0, %c0_i32, %c0_i32_0 : i32, i32, i32
  }
  func.func @transform_2(%arg0: i32, %arg1: i32, %arg2: memref<2xf32, #tpu.memory_space<smem>>) -> (i32, i32, i32) {
    %c0_i32 = arith.constant 0 : i32
    %c0_i32_0 = arith.constant 0 : i32
    return %arg0, %c0_i32, %arg1 : i32, i32, i32
  }
}

</mosaic_0001>

<bundles_post_ra>
// kernel: tpu_custom_call.1
= control target key start
LH: loop header
LB: loop body
LE: loop exit
PB: predicated region body
PF: predicated region fallthrough
CT: control target
= control target key end

     0   :  { %s622_s15 = smov [#allocation3]   ;;  %s778_s0 = inlined_call_operand.hbm [shape: f32[2], index: 0, kind: input, shape index: {}]   ;;  %s779_s1 = inlined_call_operand.hbm [shape: f32[2,8,32], index: 1, kind: input, shape index: {}]   ;;  %s780_s2 = inlined_call_operand.hbm [shape: f32[2,1,8], index: 2, kind: input, shape index: {}]   ;;  %s781_s3 = inlined_call_operand.hbm [shape: f32[2,1,32], index: 3, kind: output, shape index: {}]  }
   0x1   :  { %s9_s14 = sshll.u32 %s778_s0, 4  ;;  %s10_s14 = int_to_ptr.hbm [resolvable:$true] %s9_s14 }
   0x2   :  { %12 = dma.hbm_to_smem %s10_s14, 16, %s622_s15, [#allocation2] }
   0x3   :  { %584 = dma.done.wait [#allocation2], 16 }
   0x4   :  { %585 = vsyncadd [#allocation2], 4294967280 }
   0x5   :  { %15 = sfence }
   0x6   :  { %16 = vsyncpa [#allocation5], 0 }
   0x7   :  { %18 = vsyncpa [#allocation5 + $0x1], 0 }
   0x8   :  { %19 = vsyncpa [#allocation8], 0 }
   0x9   :  { %21 = vsyncpa [#allocation8 + $0x1], 0 }
   0xa   :  { %22 = vsyncpa [#allocation6], 0 }
   0xb   :  { %24 = vsyncpa [#allocation6 + $0x1], 0  ;;  %s646_s16 = smov 0   ;;  %s648_s17 = smov 0  }
   0xc   :  { %s650_s18 = smov 0   ;;  %s652_s19 = smov 0  }
   0xd   :  { %s654_s0 = smov 0   ;;  %s656_s20 = smov 0  }
   0xe LB: > { %s377_s21 = sadd.s32 4294967295, %s620_s20   ;;  %s378_s22 = sadd.s32 4294967294, %s620_s20   ;;  %s620_s20 = sphi %s656_s20, %s30_s20   ;;  %s616_s0 = sphi %s654_s0, %s790_s0   ;;  %s612_s19 = sphi %s652_s19, %s789_s19   ;;  %s608_s18 = sphi %s650_s18, %s788_s18   ;;  %s604_s17 = sphi %s648_s17, %s787_s17   ;;  %s600_s16 = sphi %s646_s16, %s786_s16  }
   0xf   : > { %s42_s23 = sadd.s32 1, %s616_s0  ;;  %s51_s24 = sadd.s32 1, %s608_s18 }
  0x10   : > { %p44_p0 = scmp.ge.s32.totalorder %s42_s23, 2  ;;  %p58_p1 = scmp.ne.s32.totalorder %s608_s18, %s604_s17 }
  0x11   : > { %p59_p2 = scmp.eq.s32.totalorder %s620_s20, 0  ;;  %p64_p3 = scmp.ne.s32.totalorder %s604_s17, %s600_s16 }
  0x12   : > { %s792_s23 = smov (%p44_p0, %s42_s23), 0  ;;  %p65_p5 = scmp.eq.s32.totalorder %s377_s21, 0 }
  0x13   : > { %p687_p4 = por %p59_p2, %p58_p1  ;;  %s46_s26 = ssub.s32 %s616_s0, %s792_s23 }
  0x14   : > { %p116_p6 = scmp.eq.s32.totalorder %s377_s21, 1  ;;  %p49_p7 = scmp.eq.s32.totalorder %s46_s26, 0 }
  0x15   : > { %p693_p8 = por %p65_p5, %p64_p3  ;;  %p122_p10 = scmp.eq.s32.totalorder %s378_s22, 1 }
  0x16   : > { %p697_p9 = por %p116_p6, %p58_p1  ;;  %p380_p12 = scmp.ge.s32.totalorder %s620_s20, 2 }
  0x17   : > { %s702_s29 = scalar_select %p49_p7, %s608_s18, %s51_s24  }
  0x18   : > { %p704_p11 = por %p122_p10, %p64_p3  ;;  %p407_p13 = scmp.lt.s32.totalorder %s620_s20, 2 }
  0x19   : > { %s142_s4 = sand.u32 1, %s608_s18   ;;  %s382_s6 = sshll.u32 %s616_s0, 3 }
  0x1a   : > { %s381_s5 = sshll.u32 %s142_s4, 3  ;;  %s151_s9 = scalar_lea.hbm %s779_s1, %s382_s6 }
  0x1b   : > { %s146_s10 = scalar_lea.vmem [#allocation4], %s381_s5  ;;  %s153_s12 = sshll.u32 %s151_s9, 4  ;;  %s154_s12 = int_to_ptr.hbm [resolvable:$true] %s153_s12 }
  0x1c   : > { %s155_s11 = sshll.u32 %s146_s10, 4  ;;  %p397_p0 = pnand %p407_p13, %p687_p4  ;;  %s156_s11 = int_to_ptr.vmem [resolvable:$true] %s155_s11 }
  0x1d   : > { %p383_p1 = scmp.ge.s32.totalorder %s620_s20, 1  ;;  %p177_p2 = scmp.lt.s32.totalorder %s620_s20, 3 }
  0x1e   : > { %s143_s13 = scalar_lea.sflag [#allocation5], %s142_s4  ;;  %s168_s21 = scalar_lea.hbm %s780_s2, %s616_s0 }
  0x1f   : > { %399 = dma.hbm_to_vmem [thread:$0]  (!%p397_p0), %s154_s12, 128, %s156_s11, %s143_s13  }
  0x20   : > { %p178_p3 = pnand %p383_p1, %p177_p2  ;;  %s165_s22 = scalar_lea.vmem [#allocation7], %s142_s4 }
  0x21   : > { %s172_s24 = sshll.u32 %s165_s22, 4  ;;  %s170_s26 = sshll.u32 %s168_s21, 4  ;;  %s173_s24 = int_to_ptr.vmem [resolvable:$true] %s172_s24  ;;  %s171_s26 = int_to_ptr.hbm [resolvable:$true] %s170_s26 }
  0x22   : > { %s163_s5 = scalar_lea.sflag [#allocation8], %s142_s4  ;;  %181 = sbr.rel (%p178_p3) target bundleno = 175 (0xaf), region = 28 }
  0x23   : > { %402 = dma.hbm_to_vmem [thread:$0]  (!%p397_p0), %s171_s26, 16, %s173_s24, %s163_s5  }
  0x24   : > { %s724_s25 = sand.u32 (!%p178_p3), 1, %s604_s17  }
  0x25   : > { %s384_s6 = sshll.u32 (!%p178_p3), %s724_s25, 3  ;;  %s184_s7 = scalar_lea.sflag (!%p178_p3), [#allocation5], %s724_s25 }
  0x26   : > { %s187_s8 = scalar_lea.vmem (!%p178_p3), [#allocation4], %s384_s6 }
  0x27   : > { %587 = dma.done.wait (%p693_p8), %s184_s7, 128  }
  0x28   : > { %589 = vsyncadd (%p693_p8), %s184_s7, 4294967168  ;;  %s194_s4 = scalar_lea.sflag [#allocation8], %s724_s25  ;;  %s196_s9 = scalar_lea.vmem [#allocation7], %s724_s25 }
  0x29   : > { %591 = dma.done.wait (%p693_p8), %s194_s4, 16  }
  0x2a   : > { %593 = vsyncadd (%p693_p8), %s194_s4, 4294967280  ;;  %s247_s10 = sld [smem:[#allocation3 + %s612_s19]]  ;;  %vm223_vm0 = vcmask 64512   ;;  %v221_v1 = vld [vmem:[%s187_s8] sm:$0xff]  ;;  %s278_s13 = scalar_lea.hbm %s781_s3, %s612_s19  ;;  %vm266_vm5 = vcmask 253952  }
  0x2b   : > { %v222_v2 = vld [vmem:[%s196_s9] sm:$0x1]  ;;  %242 = vmatpush.msra.mxu0 %v221_v1  ;;  %s220_s14 = scalar_lea.vmem [#allocation9], %s724_s25  ;;  %s282_s21 = sshll.u32 %s278_s13, 4  ;;  %s283_s21 = int_to_ptr.hbm [resolvable:$true] %s282_s21 }
  0x2c   : > { %385 = vmatmul.msk.f32.vlgmr.msra.gmra.mxu0 %vm223_vm0, %v222_v2  ;;  %s280_s15 = sshll.u32 %s220_s14, 4  ;;  %s269_s22 = scalar_lea.sflag [#allocation6], %s724_s25  ;;  %s281_s15 = int_to_ptr.vmem [resolvable:$true] %s280_s15 }
  0x2d   : > { %s546_s24 = sshra.s32 %s283_s21, 4  ;;  %s552_s6 = scalar_lea.hbm %s781_s3, 2  ;;  %s547_s24 = int_to_ptr.hbm [resolvable:$true] %s546_s24 }
  0x2e   : > { %s548_s26 = scalar_lea.hbm %s547_s24, 1  ;;  %p553_p7 = scmp.lt.s32.totalorder %s547_s24, %s781_s3 }
  0x2f   : > { %p549_p4 = scmp.ne.s32.totalorder %s547_s24, %s548_s26  ;;  %p554_p8 = scmp.lt.s32.totalorder %s552_s6, %s548_s26 }
  0x30   : > { %v248_v0 = vstv %s247_s10 }
  0x31   : > { %458 = vrcp.f32 %v248_v0  ;;  %v260_v5 = vand.u32 2147483648, %v248_v0  ;;  %vm254_vm1 = vweird.f32 %v248_v0  ;;  %v258_v7 = vand.u32 2147483647, %v248_v0  ;;  %p550_p5 = pnand %p549_p4, %p697_p9  ;;  %p555_p10 = por %p554_p8, %p553_p7 }
  0x33   : > { %v261_v9 = vor.u32 1.1754944e-38, %v260_v5  ;;  %vm259_vm4 = vcmp.eq.f32.partialorder %v258_v7, 8.507059e+37  ;;  %p551_p6 = pneg %p550_p5 }
  0x35   : > { %p556_p13 = pnand %p555_p10, %p551_p6 }
  0x37   : > { %v459_v3 = vpop.eup %458 }
  0x38   : > { %v250_v4 = vmul.f32 %v459_v3, %v248_v0  ;;  %vm255_vm2 = vweird.f32 %v459_v3 }
  0x39   : > { %vm256_vm3 = vmor %vm254_vm1, %vm255_vm2 }
  0x3a   : > { %v251_v6 = vsub.f32 1.0, %v250_v4 }
  0x3c   : > { %v252_v8 = vmul.f32 %v459_v3, %v251_v6 }
  0x3e   : > { %v253_v10 = vadd.f32 %v459_v3, %v252_v8 }
  0x40   : > { %v257_v11 = vsel %vm256_vm3, %v459_v3, %v253_v10 }
  0x41   : > { %v262_v12 = vsel %vm259_vm4, %v261_v9, %v257_v11 }
  0x42   : > { %388 = vpush %v262_v12 }
  0x73   : > { %s389_s27 = spop %388 }
  0x74   : > { %v264_v13 = vstv %s389_s27 }
  0xa9   : > { %v244_v14 = vpop.f32.mrf.mxu0 }
  0xaa   : > { %v265_v15 = vmul.f32 %v264_v13, %v244_v14 }
  0xac   : > { %267 = vst.msk [vmem:[%s220_s14] sm:$0x1] %vm266_vm5, %v265_v15 }
  0xad   : > { %559 = shalt.err (!%p556_p13)
}
  0xae   : > { %394 = dma.vmem_to_hbm [thread:$0]  (%p697_p9), %s281_s15, 16, %s283_s21, %s269_s22  }
  0xaf PF: > { %s294_s25 = sand.u32 1, %s600_s16   ;;  %p404_p0 = pnand %p380_p12, %p704_p11 }
  0xb0   : > { %s295_s4 = scalar_lea.sflag [#allocation6], %s294_s25 }
  0xb1   : > { %p405_p1 = pneg %p404_p0 }
  0xb3   : > { %595 = dma.done.wait (%p405_p1), %s295_s4, 16  }
  0xb4   : > { %597 = vsyncadd (%p405_p1), %s295_s4, 4294967280  ;;  %s30_s20 = sadd.s32 1, %s620_s20   ;;  %s786_s16 = smov %s604_s17 }
  0xb5   : > { %p27_p2 = scmp.ge.s32.totalorder %s30_s20, 4   ;;  %s787_s17 = smov %s608_s18 }
  0xb6   : > { %s788_s18 = smov %s702_s29  ;;  %s789_s19 = smov %s616_s0 }
  0xb7   : > { %s790_s0 = smov %s792_s23  ;;  %29 = sbr.rel (!%p27_p2) target bundleno = 14 (0xe), region = 86 }
  0xbc   :  { %300 = vsyncpa [#allocation5], 1 }
  0xbd   :  { %302 = vsyncpa [#allocation5 + $0x1], 1 }
  0xbe   :  { %303 = vsyncpa [#allocation8], 1 }
  0xbf   :  { %305 = vsyncpa [#allocation8 + $0x1], 1 }
  0xc0   :  { %306 = vsyncpa [#allocation6], 1 }
  0xc1   :  { %308 = vsyncpa [#allocation6 + $0x1], 1 }

</bundles_post_ra>
